<compile_context>
chip_gen: v7x
topology: tpu7x:2x2x1
jax: 0.10.0
libtpu: 0.0.40
codegen_flags: <defaults>
</compile_context>

<pallas_src>
import functools

import jax
import jax.numpy as jnp
from jax import lax
from jax.experimental import pallas as pl
from jax.experimental.pallas import tpu as pltpu

# ----------------------------- config (synthetic) -----------------------------
HIDDEN = 32          # encoder_hidden == variance_filter_size
KERNEL = 3           # variance_kernel
PAD = (KERNEL - 1) // 2
LN_EPS = 1e-5


# --------------------------------- kernel -------------------------------------
def variance_predictor_kernel(
    xp_ref,                               # (BB, T + 2*PAD, H) zero-padded input
    w1_ref, b1_ref, g1_ref, be1_ref,      # conv1 (K*H, H),(1,H); ln1 (1,H),(1,H)
    w2_ref, b2_ref, g2_ref, be2_ref,      # conv2 / ln2
    wl_ref, bl_ref,                       # linear (1,H),(1,1)
    o_ref,                                # (BB, T)  lane-dense output block
    hpad_ref,                             # scratch VMEM (BB, T + 2*PAD, H) f32
):
    BB, TP, H = xp_ref.shape
    K = w1_ref.shape[0] // H
    pad = (K - 1) // 2
    T = TP - 2 * pad

    def conv_from_padded_ref(ref, w_ref, b_ref):
        # K static slices of the zero-padded ref (cheap shifted views), fused
        # into one (BB*T, K*H) slab -> a single MXU push of depth K*H.
        taps = [ref[:, k:k + T, :].astype(jnp.float32).reshape(BB * T, H)
                for k in range(K)]
        slab = jnp.concatenate(taps, axis=-1)                    # (BB*T, K*H)
        y = jnp.dot(slab, w_ref[...].astype(jnp.float32),
                    preferred_element_type=jnp.float32)          # (BB*T, H)
        return y.reshape(BB, T, H) + b_ref[...].astype(jnp.float32)

    def layer_norm(y, g_ref, be_ref):
        mu = jnp.mean(y, axis=-1, keepdims=True)
        var = jnp.mean((y - mu) ** 2, axis=-1, keepdims=True)
        yhat = (y - mu) * lax.rsqrt(var + LN_EPS)
        return yhat * g_ref[...].astype(jnp.float32) + be_ref[...].astype(jnp.float32)

    # ----- block 1: conv -> relu -> layernorm -> (dropout = identity) -----
    h = conv_from_padded_ref(xp_ref, w1_ref, b1_ref)
    h = jnp.maximum(h, 0.0)
    h = layer_norm(h, g1_ref, be1_ref)

    # Stage h into a zero-padded VMEM scratch so conv2 also reads ref slices
    # (no value-level concatenate-with-zeros along the sublane axis).
    if pad:
        zpad = jnp.zeros((BB, pad, H), jnp.float32)
        hpad_ref[:, :pad, :] = zpad
        hpad_ref[:, pad + T:, :] = zpad
    hpad_ref[:, pad:pad + T, :] = h

    # ----- block 2 -----
    h = conv_from_padded_ref(hpad_ref, w2_ref, b2_ref)
    h = jnp.maximum(h, 0.0)
    h = layer_norm(h, g2_ref, be2_ref)

    # ----- final Linear(H -> 1): VPU broadcast-mul + lane reduce -----
    out = jnp.sum(h * wl_ref[...].astype(jnp.float32), axis=-1)   # (BB, T)
    out = out + bl_ref[...].astype(jnp.float32)                   # (1,1) broadcast
    o_ref[...] = out.astype(o_ref.dtype)


# --------------------------------- wrapper -------------------------------------
@functools.partial(jax.jit, static_argnames=("batch_block",))
def variance_predictor(x, params, mask=None, *, batch_block=None):
    """x: (B, T, H) float32; returns (B, T) float32.

    mask (optional, bool (B, T)): True at positions to be zeroed
    (== torch masked_fill(mask, 0.0)).
    """
    B, T, H = x.shape
    (w1, b1, g1, be1, w2, b2, g2, be2, wl, bl) = params

    if batch_block is None:
        batch_block = 8 if B % 8 == 0 else B
    assert B % batch_block == 0, (B, batch_block)
    assert batch_block % 8 == 0 or batch_block == B, (B, batch_block)

    # Zero-pad T once in the wrapper; the kernel reads shifted static slices.
    xp = jnp.pad(x, ((0, 0), (PAD, PAD), (0, 0)))
    Tp = T + 2 * PAD

    full = lambda shape: pl.BlockSpec(shape, lambda b: (0,) * len(shape))

    out = pl.pallas_call(
        variance_predictor_kernel,
        out_shape=jax.ShapeDtypeStruct((B, T), jnp.float32),
        grid_spec=pltpu.PrefetchScalarGridSpec(
            num_scalar_prefetch=0,
            grid=(B // batch_block,),
            in_specs=[
                pl.BlockSpec((batch_block, Tp, H), lambda b: (b, 0, 0)),   # x (padded)
                full(w1.shape), full(b1.shape), full(g1.shape), full(be1.shape),
                full(w2.shape), full(b2.shape), full(g2.shape), full(be2.shape),
                full(wl.shape), full(bl.shape),
            ],
            out_specs=pl.BlockSpec((batch_block, T), lambda b: (b, 0)),    # lane-dense
            scratch_shapes=[pltpu.VMEM((batch_block, Tp, H), jnp.float32)],
        ),
        compiler_params=pltpu.CompilerParams(
            dimension_semantics=("parallel",),
            vmem_limit_bytes=32 * 1024 * 1024,
        ),
    )(xp, w1, b1, g1, be1, w2, b2, g2, be2, wl, bl)

    if mask is not None:
        out = jnp.where(mask, 0.0, out)       # masked_fill(mask, 0.0)
    return out


# ------------------------- deterministic parameter init ------------------------
def init_params(key, hidden=HIDDEN, kernel=KERNEL):
    ks = jax.random.split(key, 6)
    sc = 1.0 / float((hidden * kernel) ** 0.5)
    sl = 1.0 / float(hidden ** 0.5)
    # PyTorch Conv1d layout (C_out, C_in, K) -> folded kernel layout (K*C_in, C_out):
    # rows [k*H:(k+1)*H] hold W_k^T so slab [x[t+0], x[t+1], x[t+2]] @ W matches conv.
    w1_pt = jax.random.uniform(ks[0], (hidden, hidden, kernel), jnp.float32, -sc, sc)
    w2_pt = jax.random.uniform(ks[1], (hidden, hidden, kernel), jnp.float32, -sc, sc)
    to_slab = lambda w: jnp.concatenate([w[:, :, k].T for k in range(kernel)], axis=0)
    w1, w2 = to_slab(w1_pt), to_slab(w2_pt)
    b1 = jax.random.uniform(ks[2], (1, hidden), jnp.float32, -sc, sc)
    b2 = jax.random.uniform(ks[3], (1, hidden), jnp.float32, -sc, sc)
    g1 = jnp.ones((1, hidden), jnp.float32)
    be1 = jnp.zeros((1, hidden), jnp.float32)
    g2 = jnp.ones((1, hidden), jnp.float32)
    be2 = jnp.zeros((1, hidden), jnp.float32)
    wl = jax.random.uniform(ks[4], (1, hidden), jnp.float32, -sl, sl)   # (1, H) row
    bl = jax.random.uniform(ks[5], (1, 1), jnp.float32, -sl, sl)
    return (w1, b1, g1, be1, w2, b2, g2, be2, wl, bl)


# ------------------------------ pure-JAX reference ------------------------------
def reference(x, params):
    (w1, b1, g1, be1, w2, b2, g2, be2, wl, bl) = params
    H = x.shape[-1]
    K = w1.shape[0] // H
    pad = (K - 1) // 2

    def conv(inp, w, b):
        xp = jnp.pad(inp, ((0, 0), (pad, pad), (0, 0)))
        T = inp.shape[1]
        wk = w.reshape(K, H, H)          # wk[k] = W_k^T : (C_in, C_out)
        y = sum(jnp.einsum("btc,cf->btf", xp[:, k:k + T, :], wk[k]) for k in range(K))
        return y + b[None]

    def ln(y, g, be):
        mu = y.mean(-1, keepdims=True)
        var = ((y - mu) ** 2).mean(-1, keepdims=True)
        return (y - mu) / jnp.sqrt(var + LN_EPS) * g[None] + be[None]

    h = ln(jnp.maximum(conv(x, w1, b1), 0.0), g1, be1)
    h = ln(jnp.maximum(conv(h, w2, b2), 0.0), g2, be2)
    return jnp.einsum("btf,f->bt", h, wl[0]) + bl[0, 0]


# ------------------------------------ main --------------------------------------
if __name__ == "__main__":
    key = jax.random.PRNGKey(0)
    kx, kp = jax.random.split(key)

    # Small shapes; B=16 so the coarsened grid has 2 parallel steps of 8 rows each.
    B, T, H = 16, 8, HIDDEN
    x = jax.random.normal(kx, (B, T, H), jnp.float32)
    params = init_params(kp)

    out = variance_predictor(x, params, mask=None)
    out = jax.block_until_ready(out)

    ref = reference(x, params)
    assert out.shape == (B, T), out.shape
    assert jnp.allclose(out, ref, atol=1e-3, rtol=1e-3), (out, ref)

    # mask path (True => zeroed), applied as wrapper glue.
    mask = jnp.zeros((B, T), bool).at[:, T // 2:].set(True)
    out_m = jax.block_until_ready(variance_predictor(x, params, mask=mask))
    assert jnp.all(out_m[:, T // 2:] == 0.0)
    assert jnp.allclose(out_m[:, : T // 2], ref[:, : T // 2], atol=1e-3, rtol=1e-3)

    print("KERNEL_OK")
</pallas_src>

<mosaic_0001>
module attributes {stable_mosaic.version = 11 : i64} {
  func.func @variance_predictor_kernel(%arg0: i32, %arg1: memref<8x10x32xf32, #tpu.memory_space<vmem>>, %arg2: memref<96x32xf32, #tpu.memory_space<vmem>>, %arg3: memref<1x32xf32, #tpu.memory_space<vmem>>, %arg4: memref<1x32xf32, #tpu.memory_space<vmem>>, %arg5: memref<1x32xf32, #tpu.memory_space<vmem>>, %arg6: memref<96x32xf32, #tpu.memory_space<vmem>>, %arg7: memref<1x32xf32, #tpu.memory_space<vmem>>, %arg8: memref<1x32xf32, #tpu.memory_space<vmem>>, %arg9: memref<1x32xf32, #tpu.memory_space<vmem>>, %arg10: memref<1x32xf32, #tpu.memory_space<vmem>>, %arg11: memref<1x1xf32, #tpu.memory_space<vmem>>, %arg12: memref<8x8xf32, #tpu.memory_space<vmem>>, %arg13: memref<8x10x32xf32, #tpu.memory_space<vmem>>) attributes {dimension_semantics = [#tpu.dimension_semantics<parallel>], iteration_bounds = array<i64: 2>, scalar_prefetch = 0 : i64, scratch_operands = 1 : i64, tpu.core_type = #tpu.core_type<tc>, window_params = [{transform_indices = @transform_0, window_bounds = array<i64: 8, 10, 32>}, {pipeline_mode = #tpu.pipeline_mode<synchronous>, transform_indices = @transform_1, window_bounds = array<i64: 96, 32>}, {pipeline_mode = #tpu.pipeline_mode<synchronous>, transform_indices = @transform_2, window_bounds = array<i64: 1, 32>}, {pipeline_mode = #tpu.pipeline_mode<synchronous>, transform_indices = @transform_3, window_bounds = array<i64: 1, 32>}, {pipeline_mode = #tpu.pipeline_mode<synchronous>, transform_indices = @transform_4, window_bounds = array<i64: 1, 32>}, {pipeline_mode = #tpu.pipeline_mode<synchronous>, transform_indices = @transform_5, window_bounds = array<i64: 96, 32>}, {pipeline_mode = #tpu.pipeline_mode<synchronous>, transform_indices = @transform_6, window_bounds = array<i64: 1, 32>}, {pipeline_mode = #tpu.pipeline_mode<synchronous>, transform_indices = @transform_7, window_bounds = array<i64: 1, 32>}, {pipeline_mode = #tpu.pipeline_mode<synchronous>, transform_indices = @transform_8, window_bounds = array<i64: 1, 32>}, {pipeline_mode = #tpu.pipeline_mode<synchronous>, transform_indices = @transform_9, window_bounds = array<i64: 1, 32>}, {pipeline_mode = #tpu.pipeline_mode<synchronous>, transform_indices = @transform_10, window_bounds = array<i64: 1, 1>}, {transform_indices = @transform_11, window_bounds = array<i64: 8, 8>}]} {
    %c0 = arith.constant 0 : index
    %c0_0 = arith.constant 0 : index
    %c0_1 = arith.constant 0 : index
    %0 = vector.load %arg1[%c0, %c0_0, %c0_1] : memref<8x10x32xf32, #tpu.memory_space<vmem>>, vector<8x8x32xf32>
    %1 = vector.shape_cast %0 : vector<8x8x32xf32> to vector<64x32xf32>
    %c0_2 = arith.constant 0 : index
    %c1 = arith.constant 1 : index
    %c0_3 = arith.constant 0 : index
    %2 = vector.load %arg1[%c0_2, %c1, %c0_3] : memref<8x10x32xf32, #tpu.memory_space<vmem>>, vector<8x8x32xf32>
    %3 = vector.shape_cast %2 : vector<8x8x32xf32> to vector<64x32xf32>
    %c0_4 = arith.constant 0 : index
    %c2 = arith.constant 2 : index
    %c0_5 = arith.constant 0 : index
    %4 = vector.load %arg1[%c0_4, %c2, %c0_5] : memref<8x10x32xf32, #tpu.memory_space<vmem>>, vector<8x8x32xf32>
    %5 = vector.shape_cast %4 : vector<8x8x32xf32> to vector<64x32xf32>
    %6 = tpu.concatenate %1, %3, %5 in 1 : vector<64x32xf32>, vector<64x32xf32>, vector<64x32xf32> -> vector<64x96xf32>
    %c0_6 = arith.constant 0 : index
    %c0_7 = arith.constant 0 : index
    %7 = vector.load %arg2[%c0_6, %c0_7] : memref<96x32xf32, #tpu.memory_space<vmem>>, vector<96x32xf32>
    %cst = arith.constant dense<0.000000e+00> : vector<64x32xf32>
    %8 = tpu.matmul %6, %7, %cst {dimension_numbers = #tpu.dot_dimension_numbers<[1], [0], [0], [1], [0, 0, 1, 1], [], []>} : vector<64x96xf32>, vector<96x32xf32>, vector<64x32xf32> -> vector<64x32xf32>
    %9 = vector.shape_cast %8 : vector<64x32xf32> to vector<8x8x32xf32>
    %c0_8 = arith.constant 0 : index
    %c0_9 = arith.constant 0 : index
    %10 = vector.load %arg3[%c0_8, %c0_9] : memref<1x32xf32, #tpu.memory_space<vmem>>, vector<1x32xf32>
    %11 = vector.shape_cast %10 : vector<1x32xf32> to vector<1x1x32xf32>
    %12 = vector.broadcast %11 : vector<1x1x32xf32> to vector<8x8x32xf32>
    %13 = arith.addf %9, %12 : vector<8x8x32xf32>
    %cst_10 = arith.constant 0.000000e+00 : f32
    %14 = vector.broadcast %cst_10 : f32 to vector<8x8x32xf32>
    %15 = arith.maximumf %13, %14 : vector<8x8x32xf32>
    %cst_11 = arith.constant dense<0.000000e+00> : vector<8x8xf32>
    %16 = vector.multi_reduction <add>, %15, %cst_11 [2] : vector<8x8x32xf32> to vector<8x8xf32>
    %17 = vector.shape_cast %16 : vector<8x8xf32> to vector<8x8x1xf32>
    %cst_12 = arith.constant 3.200000e+01 : f32
    %18 = vector.broadcast %cst_12 : f32 to vector<8x8x1xf32>
    %19 = arith.divf %17, %18 : vector<8x8x1xf32>
    %20 = vector.broadcast %19 : vector<8x8x1xf32> to vector<8x8x32xf32>
    %21 = arith.subf %15, %20 : vector<8x8x32xf32>
    %22 = arith.mulf %21, %21 : vector<8x8x32xf32>
    %cst_13 = arith.constant dense<0.000000e+00> : vector<8x8xf32>
    %23 = vector.multi_reduction <add>, %22, %cst_13 [2] : vector<8x8x32xf32> to vector<8x8xf32>
    %24 = vector.shape_cast %23 : vector<8x8xf32> to vector<8x8x1xf32>
    %cst_14 = arith.constant 3.200000e+01 : f32
    %25 = vector.broadcast %cst_14 : f32 to vector<8x8x1xf32>
    %26 = arith.divf %24, %25 : vector<8x8x1xf32>
    %27 = vector.broadcast %19 : vector<8x8x1xf32> to vector<8x8x32xf32>
    %28 = arith.subf %15, %27 : vector<8x8x32xf32>
    %cst_15 = arith.constant 9.99999974E-6 : f32
    %29 = vector.broadcast %cst_15 : f32 to vector<8x8x1xf32>
    %30 = arith.addf %26, %29 : vector<8x8x1xf32>
    %31 = math.rsqrt %30 : vector<8x8x1xf32>
    %32 = vector.broadcast %31 : vector<8x8x1xf32> to vector<8x8x32xf32>
    %33 = arith.mulf %28, %32 : vector<8x8x32xf32>
    %c0_16 = arith.constant 0 : index
    %c0_17 = arith.constant 0 : index
    %34 = vector.load %arg4[%c0_16, %c0_17] : memref<1x32xf32, #tpu.memory_space<vmem>>, vector<1x32xf32>
    %35 = vector.shape_cast %34 : vector<1x32xf32> to vector<1x1x32xf32>
    %36 = vector.broadcast %35 : vector<1x1x32xf32> to vector<8x8x32xf32>
    %37 = arith.mulf %33, %36 : vector<8x8x32xf32>
    %c0_18 = arith.constant 0 : index
    %c0_19 = arith.constant 0 : index
    %38 = vector.load %arg5[%c0_18, %c0_19] : memref<1x32xf32, #tpu.memory_space<vmem>>, vector<1x32xf32>
    %39 = vector.shape_cast %38 : vector<1x32xf32> to vector<1x1x32xf32>
    %40 = vector.broadcast %39 : vector<1x1x32xf32> to vector<8x8x32xf32>
    %41 = arith.addf %37, %40 : vector<8x8x32xf32>
    %cst_20 = arith.constant 0.000000e+00 : f32
    %42 = vector.broadcast %cst_20 : f32 to vector<8x1x32xf32>
    %c0_21 = arith.constant 0 : index
    %c0_22 = arith.constant 0 : index
    %c0_23 = arith.constant 0 : index
    %43 = vector.load %arg13[%c0_21, %c0_22, %c0_23] : memref<8x10x32xf32, #tpu.memory_space<vmem>>, vector<8x1x32xf32>
    tpu.vector_store %arg13[%c0_21, %c0_22, %c0_23], %42 {strides = array<i32>} : memref<8x10x32xf32, #tpu.memory_space<vmem>>, vector<8x1x32xf32>,
    %c0_24 = arith.constant 0 : index
    %c9 = arith.constant 9 : index
    %c0_25 = arith.constant 0 : index
    %44 = vector.load %arg13[%c0_24, %c9, %c0_25] : memref<8x10x32xf32, #tpu.memory_space<vmem>>, vector<8x1x32xf32>
    tpu.vector_store %arg13[%c0_24, %c9, %c0_25], %42 {strides = array<i32>} : memref<8x10x32xf32, #tpu.memory_space<vmem>>, vector<8x1x32xf32>,
    %c0_26 = arith.constant 0 : index
    %c1_27 = arith.constant 1 : index
    %c0_28 = arith.constant 0 : index
    %45 = vector.load %arg13[%c0_26, %c1_27, %c0_28] : memref<8x10x32xf32, #tpu.memory_space<vmem>>, vector<8x8x32xf32>
    tpu.vector_store %arg13[%c0_26, %c1_27, %c0_28], %41 {strides = array<i32>} : memref<8x10x32xf32, #tpu.memory_space<vmem>>, vector<8x8x32xf32>,
    %c0_29 = arith.constant 0 : index
    %c0_30 = arith.constant 0 : index
    %c0_31 = arith.constant 0 : index
    %46 = vector.load %arg13[%c0_29, %c0_30, %c0_31] : memref<8x10x32xf32, #tpu.memory_space<vmem>>, vector<8x8x32xf32>
    %47 = vector.shape_cast %46 : vector<8x8x32xf32> to vector<64x32xf32>
    %c0_32 = arith.constant 0 : index
    %c1_33 = arith.constant 1 : index
    %c0_34 = arith.constant 0 : index
    %48 = vector.load %arg13[%c0_32, %c1_33, %c0_34] : memref<8x10x32xf32, #tpu.memory_space<vmem>>, vector<8x8x32xf32>
    %49 = vector.shape_cast %48 : vector<8x8x32xf32> to vector<64x32xf32>
    %c0_35 = arith.constant 0 : index
    %c2_36 = arith.constant 2 : index
    %c0_37 = arith.constant 0 : index
    %50 = vector.load %arg13[%c0_35, %c2_36, %c0_37] : memref<8x10x32xf32, #tpu.memory_space<vmem>>, vector<8x8x32xf32>
    %51 = vector.shape_cast %50 : vector<8x8x32xf32> to vector<64x32xf32>
    %52 = tpu.concatenate %47, %49, %51 in 1 : vector<64x32xf32>, vector<64x32xf32>, vector<64x32xf32> -> vector<64x96xf32>
    %c0_38 = arith.constant 0 : index
    %c0_39 = arith.constant 0 : index
    %53 = vector.load %arg6[%c0_38, %c0_39] : memref<96x32xf32, #tpu.memory_space<vmem>>, vector<96x32xf32>
    %cst_40 = arith.constant dense<0.000000e+00> : vector<64x32xf32>
    %54 = tpu.matmul %52, %53, %cst_40 {dimension_numbers = #tpu.dot_dimension_numbers<[1], [0], [0], [1], [0, 0, 1, 1], [], []>} : vector<64x96xf32>, vector<96x32xf32>, vector<64x32xf32> -> vector<64x32xf32>
    %55 = vector.shape_cast %54 : vector<64x32xf32> to vector<8x8x32xf32>
    %c0_41 = arith.constant 0 : index
    %c0_42 = arith.constant 0 : index
    %56 = vector.load %arg7[%c0_41, %c0_42] : memref<1x32xf32, #tpu.memory_space<vmem>>, vector<1x32xf32>
    %57 = vector.shape_cast %56 : vector<1x32xf32> to vector<1x1x32xf32>
    %58 = vector.broadcast %57 : vector<1x1x32xf32> to vector<8x8x32xf32>
    %59 = arith.addf %55, %58 : vector<8x8x32xf32>
    %cst_43 = arith.constant 0.000000e+00 : f32
    %60 = vector.broadcast %cst_43 : f32 to vector<8x8x32xf32>
    %61 = arith.maximumf %59, %60 : vector<8x8x32xf32>
    %cst_44 = arith.constant dense<0.000000e+00> : vector<8x8xf32>
    %62 = vector.multi_reduction <add>, %61, %cst_44 [2] : vector<8x8x32xf32> to vector<8x8xf32>
    %63 = vector.shape_cast %62 : vector<8x8xf32> to vector<8x8x1xf32>
    %cst_45 = arith.constant 3.200000e+01 : f32
    %64 = vector.broadcast %cst_45 : f32 to vector<8x8x1xf32>
    %65 = arith.divf %63, %64 : vector<8x8x1xf32>
    %66 = vector.broadcast %65 : vector<8x8x1xf32> to vector<8x8x32xf32>
    %67 = arith.subf %61, %66 : vector<8x8x32xf32>
    %68 = arith.mulf %67, %67 : vector<8x8x32xf32>
    %cst_46 = arith.constant dense<0.000000e+00> : vector<8x8xf32>
    %69 = vector.multi_reduction <add>, %68, %cst_46 [2] : vector<8x8x32xf32> to vector<8x8xf32>
    %70 = vector.shape_cast %69 : vector<8x8xf32> to vector<8x8x1xf32>
    %cst_47 = arith.constant 3.200000e+01 : f32
    %71 = vector.broadcast %cst_47 : f32 to vector<8x8x1xf32>
    %72 = arith.divf %70, %71 : vector<8x8x1xf32>
    %73 = vector.broadcast %65 : vector<8x8x1xf32> to vector<8x8x32xf32>
    %74 = arith.subf %61, %73 : vector<8x8x32xf32>
    %cst_48 = arith.constant 9.99999974E-6 : f32
    %75 = vector.broadcast %cst_48 : f32 to vector<8x8x1xf32>
    %76 = arith.addf %72, %75 : vector<8x8x1xf32>
    %77 = math.rsqrt %76 : vector<8x8x1xf32>
    %78 = vector.broadcast %77 : vector<8x8x1xf32> to vector<8x8x32xf32>
    %79 = arith.mulf %74, %78 : vector<8x8x32xf32>
    %c0_49 = arith.constant 0 : index
    %c0_50 = arith.constant 0 : index
    %80 = vector.load %arg8[%c0_49, %c0_50] : memref<1x32xf32, #tpu.memory_space<vmem>>, vector<1x32xf32>
    %81 = vector.shape_cast %80 : vector<1x32xf32> to vector<1x1x32xf32>
    %82 = vector.broadcast %81 : vector<1x1x32xf32> to vector<8x8x32xf32>
    %83 = arith.mulf %79, %82 : vector<8x8x32xf32>
    %c0_51 = arith.constant 0 : index
    %c0_52 = arith.constant 0 : index
    %84 = vector.load %arg9[%c0_51, %c0_52] : memref<1x32xf32, #tpu.memory_space<vmem>>, vector<1x32xf32>
    %85 = vector.shape_cast %84 : vector<1x32xf32> to vector<1x1x32xf32>
    %86 = vector.broadcast %85 : vector<1x1x32xf32> to vector<8x8x32xf32>
    %87 = arith.addf %83, %86 : vector<8x8x32xf32>
    %c0_53 = arith.constant 0 : index
    %c0_54 = arith.constant 0 : index
    %88 = vector.load %arg10[%c0_53, %c0_54] : memref<1x32xf32, #tpu.memory_space<vmem>>, vector<1x32xf32>
    %89 = vector.shape_cast %88 : vector<1x32xf32> to vector<1x1x32xf32>
    %90 = vector.broadcast %89 : vector<1x1x32xf32> to vector<8x8x32xf32>
    %91 = arith.mulf %87, %90 : vector<8x8x32xf32>
    %cst_55 = arith.constant dense<0.000000e+00> : vector<8x8xf32>
    %92 = vector.multi_reduction <add>, %91, %cst_55 [2] : vector<8x8x32xf32> to vector<8x8xf32>
    %c0_56 = arith.constant 0 : index
    %c0_57 = arith.constant 0 : index
    %93 = vector.load %arg11[%c0_56, %c0_57] : memref<1x1xf32, #tpu.memory_space<vmem>>, vector<1x1xf32>
    %94 = vector.broadcast %93 : vector<1x1xf32> to vector<8x8xf32>
    %95 = arith.addf %92, %94 : vector<8x8xf32>
    %c0_58 = arith.constant 0 : index
    %c0_59 = arith.constant 0 : index
    %96 = vector.load %arg12[%c0_58, %c0_59] : memref<8x8xf32, #tpu.memory_space<vmem>>, vector<8x8xf32>
    tpu.vector_store %arg12[%c0_58, %c0_59], %95 {strides = array<i32>} : memref<8x8xf32, #tpu.memory_space<vmem>>, vector<8x8xf32>,
    return
  }
  func.func @transform_0(%arg0: i32) -> (i32, i32, i32) {
    %c0_i32 = arith.constant 0 : i32
    %c0_i32_0 = arith.constant 0 : i32
    %c0_i32_1 = arith.constant 0 : i32
    return %arg0, %c0_i32, %c0_i32_0 : i32, i32, i32
  }
  func.func @transform_1(%arg0: i32) -> (i32, i32) {
    %c0_i32 = arith.constant 0 : i32
    %c0_i32_0 = arith.constant 0 : i32
    %c0_i32_1 = arith.constant 0 : i32
    return %c0_i32, %c0_i32_0 : i32, i32
  }
  func.func @transform_2(%arg0: i32) -> (i32, i32) {
    %c0_i32 = arith.constant 0 : i32
    %c0_i32_0 = arith.constant 0 : i32
    %c0_i32_1 = arith.constant 0 : i32
    return %c0_i32, %c0_i32_0 : i32, i32
  }
  func.func @transform_3(%arg0: i32) -> (i32, i32) {
    %c0_i32 = arith.constant 0 : i32
    %c0_i32_0 = arith.constant 0 : i32
    %c0_i32_1 = arith.constant 0 : i32
    return %c0_i32, %c0_i32_0 : i32, i32
  }
  func.func @transform_4(%arg0: i32) -> (i32, i32) {
    %c0_i32 = arith.constant 0 : i32
    %c0_i32_0 = arith.constant 0 : i32
    %c0_i32_1 = arith.constant 0 : i32
    return %c0_i32, %c0_i32_0 : i32, i32
  }
  func.func @transform_5(%arg0: i32) -> (i32, i32) {
    %c0_i32 = arith.constant 0 : i32
    %c0_i32_0 = arith.constant 0 : i32
    %c0_i32_1 = arith.constant 0 : i32
    return %c0_i32, %c0_i32_0 : i32, i32
  }
  func.func @transform_6(%arg0: i32) -> (i32, i32) {
    %c0_i32 = arith.constant 0 : i32
    %c0_i32_0 = arith.constant 0 : i32
    %c0_i32_1 = arith.constant 0 : i32
    return %c0_i32, %c0_i32_0 : i32, i32
  }
  func.func @transform_7(%arg0: i32) -> (i32, i32) {
    %c0_i32 = arith.constant 0 : i32
    %c0_i32_0 = arith.constant 0 : i32
    %c0_i32_1 = arith.constant 0 : i32
    return %c0_i32, %c0_i32_0 : i32, i32
  }
  func.func @transform_8(%arg0: i32) -> (i32, i32) {
    %c0_i32 = arith.constant 0 : i32
    %c0_i32_0 = arith.constant 0 : i32
    %c0_i32_1 = arith.constant 0 : i32
    return %c0_i32, %c0_i32_0 : i32, i32
  }
  func.func @transform_9(%arg0: i32) -> (i32, i32) {
    %c0_i32 = arith.constant 0 : i32
    %c0_i32_0 = arith.constant 0 : i32
    %c0_i32_1 = arith.constant 0 : i32
    return %c0_i32, %c0_i32_0 : i32, i32
  }
  func.func @transform_10(%arg0: i32) -> (i32, i32) {
    %c0_i32 = arith.constant 0 : i32
    %c0_i32_0 = arith.constant 0 : i32
    %c0_i32_1 = arith.constant 0 : i32
    return %c0_i32, %c0_i32_0 : i32, i32
  }
  func.func @transform_11(%arg0: i32) -> (i32, i32) {
    %c0_i32 = arith.constant 0 : i32
    %c0_i32_0 = arith.constant 0 : i32
    return %arg0, %c0_i32 : i32, i32
  }
}

</mosaic_0001>

<bundles_post_ra>
// kernel: variance_predictor.1
= control target key start
LH: loop header
LB: loop body
LE: loop exit
PB: predicated region body
PF: predicated region fallthrough
CT: control target
= control target key end

     0   :  { %s1711_s19 = smov 0   ;;  %s2107_s0 = inlined_call_operand.vmem [shape: f32[16,10,32], index: 0, kind: input, shape index: {}]   ;;  %s2108_s1 = inlined_call_operand.vmem [shape: f32[96,32], index: 1, kind: input, shape index: {}]   ;;  %s2109_s2 = inlined_call_operand.vmem [shape: f32[1,32], index: 2, kind: input, shape index: {}]   ;;  %s2110_s3 = inlined_call_operand.vmem [shape: f32[1,32], index: 3, kind: input, shape index: {}]   ;;  %s2111_s4 = inlined_call_operand.vmem [shape: f32[1,32], index: 4, kind: input, shape index: {}]   ;;  %s2112_s5 = inlined_call_operand.vmem [shape: f32[96,32], index: 5, kind: input, shape index: {}]   ;;  %s2113_s6 = inlined_call_operand.vmem [shape: f32[1,32], index: 6, kind: input, shape index: {}]   ;;  %s2114_s7 = inlined_call_operand.vmem [shape: f32[1,32], index: 7, kind: input, shape index: {}]   ;;  %s2115_s8 = inlined_call_operand.vmem [shape: f32[1,32], index: 8, kind: input, shape index: {}]   ;;  %s2116_s9 = inlined_call_operand.vmem [shape: f32[1,32], index: 9, kind: input, shape index: {}]   ;;  %s2117_s10 = inlined_call_operand.<no memory space> [shape: f32[1,1], index: 10, kind: input, shape index: {}]   ;;  %s2118_s11 = inlined_call_operand.vmem [shape: f32[16,8], index: 11, kind: output, shape index: {}]  }
   0x1   :  { %v16_v0 = vstv %s2117_s10 }
   0x2   :  { %17 = vst [vmem:[#allocation3] sm:$0x1] %v16_v0 }
   0x3 LB: > { %s1717_s20 = sadd.s32 4294967295, %s1642_s19   ;;  %p1398_p0 = scmp.ge.s32.totalorder %s1642_s19, 1  ;;  %s1642_s19 = sphi %s1711_s19, %s23_s19  }
   0x4   : > { %p341_p1 = scmp.lt.s32.totalorder %s1642_s19, 3 }
   0x6   : > { %p342_p2 = pnand %p1398_p0, %p341_p1 }
   0x7   : > { %s1399_s21 = sshll.u32 (!%p342_p2), %s1717_s20, 3  ;;  %v498_v1 = vld [vmem:[%s2108_s1] sm:$0xff] (!%p342_p2)  ;;  %v499_v2 = vld [vmem:[%s2108_s1 + $0x8] sm:$0xff] (!%p342_p2)  ;;  %v500_v3 = vld [vmem:[%s2108_s1 + $0x10] sm:$0xff] (!%p342_p2)  ;;  %s1644_s23 = smov (!%p342_p2), 64   ;;  %vm480_vm0 = vcmask (!%p342_p2), 261120  }
   0x8   : > { %345 = sbr.rel (%p342_p2) target bundleno = 1518 (0x5ee), region = 64  ;;  %p382_p3 = scmp.lt.s32.totalorder (!%p342_p2), %s1399_s21, 15  ;;  %v1542_v4 = vpack.c.bf16 (!%p342_p2), %v499_v2, %v498_v1  ;;  %v501_v5 = vld [vmem:[%s2108_s1 + $0x18] sm:$0xff] (!%p342_p2)  ;;  %v502_v7 = vld [vmem:[%s2108_s1 + $0x20] sm:$0xff] (!%p342_p2)  ;;  %v503_v8 = vld [vmem:[%s2108_s1 + $0x28] sm:$0xff] (!%p342_p2)  ;;  %vm489_vm1 = vcmask (!%p342_p2), 523264  }
   0x9   : > { %v1546_v6 = vpack.c.bf16 (!%p342_p2), %v501_v5, %v500_v3  ;;  %v1550_v9 = vpack.c.bf16 (!%p342_p2), %v503_v8, %v502_v7  ;;  %v504_v10 = vld [vmem:[%s2108_s1 + $0x30] sm:$0xff] (!%p342_p2)  ;;  %v505_v13 = vld [vmem:[%s2108_s1 + $0x38] sm:$0xff] (!%p342_p2)  ;;  %s1645_s24 = smov (!%p342_p2), 32   ;;  %v506_v17 = vld [vmem:[%s2108_s1 + $0x40] sm:$0xff] (!%p342_p2)  ;;  %vm510_vm2 = vcmask (!%p342_p2), 785408   ;;  %vm798_vm3 = vcmask (!%p342_p2), 253952  }
   0xa   : > { %1543 = vmatprep.subr.bf16.mxu0 (!%p342_p2), %v1542_v4  ;;  %v1554_v16 = vpack.c.bf16 (!%p342_p2), %v505_v13, %v504_v10  ;;  %v507_v18 = vld [vmem:[%s2108_s1 + $0x48] sm:$0xff] (!%p342_p2)  ;;  %v508_v22 = vld [vmem:[%s2108_s1 + $0x50] sm:$0xff] (!%p342_p2)  ;;  %v509_v23 = vld [vmem:[%s2108_s1 + $0x58] sm:$0xff] (!%p342_p2)  ;;  %p388_p4 = scmp.lt.s32.totalorder (!%p342_p2), %s1717_s20, 1  ;;  %vm1324_vm4 = vcmask (!%p342_p2), 1041409   ;;  %vm1326_vm5 = vcmask (!%p342_p2), 1042434  }
   0xb   : > { %1545 = vmatpush3.bf16.msra.mxu0 (!%p342_p2), %v1542_v4  ;;  %v1558_v21 = vpack.c.bf16 (!%p342_p2), %v507_v18, %v506_v17  ;;  %v1562_v26 = vpack.c.bf16 (!%p342_p2), %v509_v23, %v508_v22  ;;  %vm1328_vm6 = vcmask (!%p342_p2), 1043459   ;;  %vm1330_vm7 = vcmask (!%p342_p2), 1044484  }
   0xc   : > { %1547 = vmatprep.subr.bf16.mxu0 (!%p342_p2), %v1546_v6  ;;  %vm1332_vm8 = vcmask (!%p342_p2), 1045509   ;;  %vm1334_vm9 = vcmask (!%p342_p2), 1046534   ;;  %vm1336_vm10 = vcmask (!%p342_p2), 1047559   ;;  %vm1339_vm11 = vcmask (!%p342_p2), 64512  }
   0xf   : > { %s2120_s21 = smov (!%p382_p3, %s1399_s21), 15  ;;  %1549 = vmatpush3.bf16.msra.mxu0 %v1546_v6  ;;  %s2122_s20 = smov (!%p388_p4, %s1717_s20), 1 }
  0x10   : > { %s1429_s14 = sshll.u32 %s2120_s21, 4  ;;  %1551 = vmatprep.subr.bf16.mxu0 %v1550_v9  ;;  %s1402_s18 = sshll.u32 %s2122_s20, 3 }
  0x11   : > { %s1743_s17 = scalar_lea.vmem %s2107_s0, %s1429_s14  ;;  %s391_s21 = scalar_lea.vmem %s2118_s11, %s1402_s18 }
  0x12   : > { %v408_v11 = vld [vmem:[%s1743_s17 + $0x2] sm:$0xff]  ;;  %v409_v14 = vld [vmem:[%s1743_s17 + $0x12] sm:$0xff] }
  0x13   : > { %v400_v12 = vld [vmem:[%s1743_s17 + $0x1] sm:$0xff]  ;;  %456 = vrot.lane.b32.xlu1 %v408_v11, %s1644_s23  ;;  %v401_v15 = vld [vmem:[%s1743_s17 + $0x11] sm:$0xff]  ;;  %1553 = vmatpush3.bf16.msra.mxu0 %v1550_v9  ;;  %v1411_v11 = vld [vmem:[%s2109_s2] ss:$0 sm:$0xff] }
  0x14   : > { %424 = vrot.lane.b32.xlu0 %v400_v12, %s1645_s24  ;;  %v403_v19 = vld [vmem:[%s1743_s17 + $0x31] sm:$0xff]  ;;  %v402_v20 = vld [vmem:[%s1743_s17 + $0x21] sm:$0xff]  ;;  %1555 = vmatprep.subr.bf16.mxu0 %v1554_v16 }
  0x15   : > { %v411_v24 = vld [vmem:[%s1743_s17 + $0x32] sm:$0xff]  ;;  %v410_v25 = vld [vmem:[%s1743_s17 + $0x22] sm:$0xff] }
  0x16   : > { %v404_v27 = vld [vmem:[%s1743_s17 + $0x41] sm:$0xff]  ;;  %v405_v28 = vld [vmem:[%s1743_s17 + $0x51] sm:$0xff] }
  0x17   : > { %458 = vrot.lane.b32.xlu1 %v409_v14, %s1644_s23  ;;  %1557 = vmatpush3.bf16.msra.mxu0 %v1554_v16  ;;  %v412_v29 = vld [vmem:[%s1743_s17 + $0x42] sm:$0xff]  ;;  %v413_v30 = vld [vmem:[%s1743_s17 + $0x52] sm:$0xff] }
  0x18   : > { %426 = vrot.lane.b32.xlu0 %v401_v15, %s1645_s24  ;;  %1559 = vmatprep.subr.bf16.mxu0 %v1558_v21  ;;  %v406_v31 = vld [vmem:[%s1743_s17 + $0x61] sm:$0xff]  ;;  %v407_v32 = vld [vmem:[%s1743_s17 + $0x71] sm:$0xff] }
  0x19   : > { %v414_v33 = vld [vmem:[%s1743_s17 + $0x62] sm:$0xff]  ;;  %v415_v34 = vld [vmem:[%s1743_s17 + $0x72] sm:$0xff] }
  0x1a   : > { %v392_v35 = vld [vmem:[%s1743_s17] sm:$0xff]  ;;  %v393_v40 = vld [vmem:[%s1743_s17 + $0x10] sm:$0xff] }
  0x1b   : > { %430 = vrot.lane.b32.xlu1 %v403_v19, %s1645_s24  ;;  %1561 = vmatpush3.bf16.msra.mxu0 %v1558_v21  ;;  %v395_v47 = vld [vmem:[%s1743_s17 + $0x30] sm:$0xff]  ;;  %v394_v48 = vld [vmem:[%s1743_s17 + $0x20] sm:$0xff] }
  0x1c   : > { %428 = vrot.lane.b32.xlu0 %v402_v20, %s1645_s24  ;;  %1563 = vmatprep.subr.bf16.mxu0 %v1562_v26  ;;  %v396_v55 = vld [vmem:[%s1743_s17 + $0x40] sm:$0xff]  ;;  %v397_v56 = vld [vmem:[%s1743_s17 + $0x50] sm:$0xff] }
  0x1d   : > { %v398_v1 = vld [vmem:[%s1743_s17 + $0x60] sm:$0xff]  ;;  %v399_v2 = vld [vmem:[%s1743_s17 + $0x70] sm:$0xff] }
  0x1f   : > { %462 = vrot.lane.b32.xlu1 %v411_v24, %s1644_s23  ;;  %1565 = vmatpush3.bf16.msra.mxu0 %v1562_v26 }
  0x20   : > { %460 = vrot.lane.b32.xlu0 %v410_v25, %s1644_s23 }
  0x23   : > { %434 = vrot.lane.b32.xlu1 %v405_v28, %s1645_s24 }
  0x24   : > { %432 = vrot.lane.b32.xlu0 %v404_v27, %s1645_s24 }
  0x27   : > { %466 = vrot.lane.b32.xlu1 %v413_v30, %s1644_s23 }
  0x28   : > { %464 = vrot.lane.b32.xlu0 %v412_v29, %s1644_s23 }
  0x2b   : > { %438 = vrot.lane.b32.xlu1 %v407_v32, %s1645_s24 }
  0x2c   : > { %436 = vrot.lane.b32.xlu0 %v406_v31, %s1645_s24 }
  0x2f   : > { %470 = vrot.lane.b32.xlu1 %v415_v34, %s1644_s23 }
  0x30   : > { %468 = vrot.lane.b32.xlu0 %v414_v33, %s1644_s23 }
  0x85   : > { %v457_v36 = vpop.permute.xlu1 %456 }
  0x86   : > { %v425_v37 = vpop.permute.xlu0 %424 }
  0x87   : > { %v481_v38 = vsel %vm480_vm0, %v392_v35, %v425_v37 }
  0x88   : > { %v490_v39 = vsel %vm489_vm1, %v481_v38, %v457_v36 }
  0x89   : > { %1494 = vmatprep.mubr.msk.f32.mxu0 %vm510_vm2, %v490_v39  ;;  %v459_v41 = vpop.permute.xlu1 %458 }
  0x8a   : > { %v427_v42 = vpop.permute.xlu0 %426 }
  0x8b   : > { %v482_v43 = vsel %vm480_vm0, %v393_v40, %v427_v42 }
  0x8c   : > { %v491_v44 = vsel %vm489_vm1, %v482_v43, %v459_v41 }
  0x8d   : > { %1495 = vmatmul.mubr.msk.f32.vlgmr.msra.gmra.mrb[0].mxu0 %vm510_vm2, %v491_v44  ;;  %v431_v45 = vpop.permute.xlu1 %430 }
  0x8e   : > { %v429_v46 = vpop.permute.xlu0 %428  ;;  %v484_v49 = vsel %vm480_vm0, %v395_v47, %v431_v45 }
  0x8f   : > { %v483_v50 = vsel %vm480_vm0, %v394_v48, %v429_v46 }
  0x91   : > { %v463_v51 = vpop.permute.xlu1 %462 }
  0x92   : > { %v461_v52 = vpop.permute.xlu0 %460  ;;  %v493_v53 = vsel %vm489_vm1, %v484_v49, %v463_v51 }
  0x93   : > { %v492_v54 = vsel %vm489_vm1, %v483_v50, %v461_v52 }
  0x94   : > { %1497 = vmatprep.mubr.msk.f32.mxu0 %vm510_vm2, %v492_v54 }
  0x95   : > { %1498 = vmatmul.mubr.msk.f32.gmra.mrb[2].mxu0 %vm510_vm2, %v493_v53  ;;  %v435_v58 = vpop.permute.xlu1 %434 }
  0x96   : > { %v433_v57 = vpop.permute.xlu0 %432  ;;  %v486_v60 = vsel %vm480_vm0, %v397_v56, %v435_v58 }
  0x97   : > { %v485_v59 = vsel %vm480_vm0, %v396_v55, %v433_v57 }
  0x99   : > { %v467_v62 = vpop.permute.xlu1 %466 }
  0x9a   : > { %v465_v61 = vpop.permute.xlu0 %464  ;;  %v495_v0 = vsel %vm489_vm1, %v486_v60, %v467_v62 }
  0x9b   : > { %v494_v63 = vsel %vm489_vm1, %v485_v59, %v465_v61 }
  0x9c   : > { %1500 = vmatprep.mubr.msk.f32.mxu0 %vm510_vm2, %v494_v63 }
  0x9d   : > { %1501 = vmatmul.mubr.msk.f32.gmra.mrb[4].mxu0 %vm510_vm2, %v495_v0  ;;  %v439_v4 = vpop.permute.xlu1 %438 }
  0x9e   : > { %v437_v3 = vpop.permute.xlu0 %436  ;;  %v488_v6 = vsel %vm480_vm0, %v399_v2, %v439_v4 }
  0x9f   : > { %v487_v5 = vsel %vm480_vm0, %v398_v1, %v437_v3 }
  0xa1   : > { %v471_v8 = vpop.permute.xlu1 %470 }
  0xa2   : > { %v469_v7 = vpop.permute.xlu0 %468  ;;  %v497_v10 = vsel %vm489_vm1, %v488_v6, %v471_v8 }
  0xa3   : > { %v496_v9 = vsel %vm489_vm1, %v487_v5, %v469_v7 }
  0xa4   : > { %1503 = vmatprep.mubr.msk.f32.mxu0 %vm510_vm2, %v496_v9 }
  0xa5   : > { %1504 = vmatmul.mubr.msk.f32.gmra.mrb[6].mxu0 %vm510_vm2, %v497_v10 }
 0x160   : > { %v1496_v12 = vpop.f32.mrb[0].mxu0 }
 0x161   : > { %v648_v13 = vadd.f32 %v1496_v12, %v1411_v11  ;;  %v601_v14 = vpop.f32.mrb[1].mxu0 }
 0x162   : > { %v647_v15 = vadd.f32 %v1411_v11, %v601_v14 }
 0x163   : > { %v656_v16 = vmax.f32 %v648_v13, 0.0 }
 0x164   : > { %v655_v17 = vmax.f32 %v647_v15, 0.0 }
 0x165   : > { %v666_v18 = vsel %vm480_vm0, %v656_v16, 0.0 }
 0x166   : > { %667 = vadd.xlane.f32.xlu1 %v666_v18  ;;  %v663_v19 = vsel %vm480_vm0, %v655_v17, 0.0 }
 0x167   : > { %664 = vadd.xlane.f32.xlu0 %v663_v19 }
 0x168   : > { %v1499_v20 = vpop.f32.mrb[2].mxu0 }
 0x169   : > { %v611_v21 = vpop.f32.mrb[3].mxu0  ;;  %v650_v22 = vadd.f32 %v1499_v20, %v1411_v11  ;;  %v1646_v20 = vmov 0.0  }
 0x16a   : > { %v649_v23 = vadd.f32 %v1411_v11, %v611_v21  ;;  %808 = vst.msk [vmem:[#allocation2 + $0x19] sm:$0x1] %vm798_vm3, %v1646_v20  ;;  %799 = vst.msk [vmem:[#allocation2] sm:$0x1] %vm798_vm3, %v1646_v20  ;;  %v927_v21 = vld [vmem:[%s2112_s5] sm:$0xff] }
 0x16b   : > { %v658_v25 = vmax.f32 %v650_v22, 0.0  ;;  %800 = vst.msk [vmem:[#allocation2 + $0x10] sm:$0x1] %vm798_vm3, %v1646_v20  ;;  %801 = vst.msk [vmem:[#allocation2 + $0x20] sm:$0x1] %vm798_vm3, %v1646_v20  ;;  %v928_v22 = vld [vmem:[%s2112_s5 + $0x8] sm:$0xff] }
 0x16c   : > { %v657_v24 = vmax.f32 %v649_v23, 0.0  ;;  %802 = vst.msk [vmem:[#allocation2 + $0x30] sm:$0x1] %vm798_vm3, %v1646_v20  ;;  %803 = vst.msk [vmem:[#allocation2 + $0x40] sm:$0x1] %vm798_vm3, %v1646_v20  ;;  %v929_v23 = vld [vmem:[%s2112_s5 + $0x10] sm:$0xff] }
 0x16d   : > { %v672_v31 = vsel %vm480_vm0, %v658_v25, 0.0  ;;  %804 = vst.msk [vmem:[#allocation2 + $0x50] sm:$0x1] %vm798_vm3, %v1646_v20  ;;  %805 = vst.msk [vmem:[#allocation2 + $0x60] sm:$0x1] %vm798_vm3, %v1646_v20 }
 0x16e   : > { %v669_v26 = vsel %vm480_vm0, %v657_v24, 0.0  ;;  %806 = vst.msk [vmem:[#allocation2 + $0x70] sm:$0x1] %vm798_vm3, %v1646_v20  ;;  %807 = vst.msk [vmem:[#allocation2 + $0x9] sm:$0x1] %vm798_vm3, %v1646_v20 }
 0x16f   : > { %670 = vadd.xlane.f32.xlu0 %v669_v26  ;;  %809 = vst.msk [vmem:[#allocation2 + $0x29] sm:$0x1] %vm798_vm3, %v1646_v20  ;;  %810 = vst.msk [vmem:[#allocation2 + $0x39] sm:$0x1] %vm798_vm3, %v1646_v20 }
 0x170   : > { %v1502_v27 = vpop.f32.mrb[4].mxu0  ;;  %811 = vst.msk [vmem:[#allocation2 + $0x49] sm:$0x1] %vm798_vm3, %v1646_v20  ;;  %812 = vst.msk [vmem:[#allocation2 + $0x59] sm:$0x1] %vm798_vm3, %v1646_v20 }
 0x171   : > { %v652_v28 = vadd.f32 %v1502_v27, %v1411_v11  ;;  %v621_v29 = vpop.f32.mrb[5].mxu0  ;;  %813 = vst.msk [vmem:[#allocation2 + $0x69] sm:$0x1] %vm798_vm3, %v1646_v20  ;;  %814 = vst.msk [vmem:[#allocation2 + $0x79] sm:$0x1] %vm798_vm3, %v1646_v20  ;;  %v931_v27 = vld [vmem:[%s2112_s5 + $0x20] sm:$0xff] }
 0x172   : > { %v651_v30 = vadd.f32 %v1411_v11, %v621_v29 }
 0x173   : > { %v660_v32 = vmax.f32 %v652_v28, 0.0  ;;  %673 = vadd.xlane.f32.xlu0 %v672_v31  ;;  %v932_v28 = vld [vmem:[%s2112_s5 + $0x28] sm:$0xff]  ;;  %v934_v31 = vld [vmem:[%s2112_s5 + $0x38] sm:$0xff] }
 0x174   : > { %v659_v33 = vmax.f32 %v651_v30, 0.0  ;;  %v1574_v29 = vpack.c.bf16 %v932_v28, %v931_v27  ;;  %v933_v30 = vld [vmem:[%s2112_s5 + $0x30] sm:$0xff] }
 0x175   : > { %v678_v34 = vsel %vm480_vm0, %v660_v32, 0.0 }
 0x176   : > { %v675_v35 = vsel %vm480_vm0, %v659_v33, 0.0 }
 0x177   : > { %679 = vadd.xlane.f32.xlu0 %v678_v34  ;;  %676 = vadd.xlane.f32.xlu1 %v675_v35 }
 0x178   : > { %v1505_v36 = vpop.f32.mrb[6].mxu0 }
 0x179   : > { %v654_v37 = vadd.f32 %v1505_v36, %v1411_v11  ;;  %v631_v38 = vpop.f32.mrb[7].mxu0 }
 0x17a   : > { %v653_v39 = vadd.f32 %v1411_v11, %v631_v38 }
 0x17b   : > { %v662_v40 = vmax.f32 %v654_v37, 0.0 }
 0x17c   : > { %v661_v41 = vmax.f32 %v653_v39, 0.0 }
 0x17d   : > { %v684_v42 = vsel %vm480_vm0, %v662_v40, 0.0 }
 0x17e   : > { %685 = vadd.xlane.f32.xlu0 %v684_v42  ;;  %v681_v43 = vsel %vm480_vm0, %v661_v41, 0.0 }
 0x17f   : > { %682 = vadd.xlane.f32.xlu1 %v681_v43 }
 0x1f3   : > { %v668_v44 = vpop.xlane.xlu1 %667 }
 0x1f4   : > { %v689_v45 = vmul.f32 0.03125, %v668_v44  ;;  %v665_v46 = vpop.xlane.xlu0 %664 }
 0x1f5   : > { %v688_v47 = vmul.f32 0.03125, %v665_v46 }
 0x1f6   : > { %v1838_v48 = vsub.f32 %v656_v16, %v689_v45  ;;  %v1921_v45 = vld [vmem:[%s2110_s3] ss:$0 sm:$0xff] }
 0x1f7   : > { %v1840_v49 = vsub.f32 %v655_v17, %v688_v47 }
 0x1f8   : > { %v705_v50 = vmul.f32 %v1838_v48, %v1838_v48 }
 0x1f9   : > { %v704_v51 = vmul.f32 %v1840_v49, %v1840_v49 }
 0x1fa   : > { %v715_v52 = vsel %vm480_vm0, %v705_v50, 0.0 }
 0x1fb   : > { %716 = vadd.xlane.f32.xlu0 %v715_v52  ;;  %v712_v53 = vsel %vm480_vm0, %v704_v51, 0.0  ;;  %v1927_v51 = vld [vmem:[%s2111_s4] ss:$0 sm:$0xff] }
 0x1fc   : > { %v671_v54 = vpop.xlane.xlu0 %670  ;;  %713 = vadd.xlane.f32.xlu1 %v712_v53 }
 0x1fd   : > { %v690_v55 = vmul.f32 0.03125, %v671_v54 }
 0x1ff   : > { %v1848_v56 = vsub.f32 %v657_v24, %v690_v55  ;;  %v1566_v24 = vpack.c.bf16 %v928_v22, %v927_v21  ;;  %v935_v55 = vld [vmem:[%s2112_s5 + $0x40] sm:$0xff] }
 0x200   : > { %v674_v57 = vpop.xlane.xlu0 %673 }
 0x201   : > { %v691_v58 = vmul.f32 0.03125, %v674_v57  ;;  %v706_v59 = vmul.f32 %v1848_v56, %v1848_v56  ;;  %1567 = vmatprep.subr.bf16.mxu1 %v1566_v24  ;;  %v936_v57 = vld [vmem:[%s2112_s5 + $0x48] sm:$0xff] }
 0x202   : > { %1569 = vmatpush3.bf16.msra.mxu1 %v1566_v24 }
 0x203   : > { %v1852_v60 = vsub.f32 %v658_v25, %v691_v58  ;;  %v718_v61 = vsel %vm480_vm0, %v706_v59, 0.0  ;;  %v930_v25 = vld [vmem:[%s2112_s5 + $0x18] sm:$0xff] }
 0x204   : > { %v680_v62 = vpop.xlane.xlu0 %679  ;;  %v677_v63 = vpop.xlane.xlu1 %676  ;;  %719 = vadd.xlane.f32.xlu1 %v718_v61  ;;  %v1570_v26 = vpack.c.bf16 %v930_v25, %v929_v23 }
 0x205   : > { %v693_v0 = vmul.f32 0.03125, %v680_v62  ;;  %v692_v1 = vmul.f32 0.03125, %v677_v63  ;;  %v707_v2 = vmul.f32 %v1852_v60, %v1852_v60  ;;  %v1582_v62 = vpack.c.bf16 %v936_v57, %v935_v55 }
 0x206   : > { %1571 = vmatprep.subr.bf16.mxu1 %v1570_v26 }
 0x207   : > { %v1857_v3 = vsub.f32 %v660_v32, %v693_v0  ;;  %v1859_v4 = vsub.f32 %v659_v33, %v692_v1  ;;  %v721_v5 = vsel %vm480_vm0, %v707_v2, 0.0  ;;  %1573 = vmatpush3.bf16.msra.mxu1 %v1570_v26  ;;  %v1578_v32 = vpack.c.bf16 %v934_v31, %v933_v30  ;;  %v937_v2 = vld [vmem:[%s2112_s5 + $0x50] sm:$0xff] }
 0x208   : > { %722 = vadd.xlane.f32.xlu0 %v721_v5  ;;  %1575 = vmatprep.subr.bf16.mxu1 %v1574_v29  ;;  %v938_v5 = vld [vmem:[%s2112_s5 + $0x58] sm:$0xff] }
 0x209   : > { %v709_v6 = vmul.f32 %v1857_v3, %v1857_v3  ;;  %v708_v7 = vmul.f32 %v1859_v4, %v1859_v4 }
 0x20b   : > { %v686_v8 = vpop.xlane.xlu0 %685  ;;  %v727_v9 = vsel %vm480_vm0, %v709_v6, 0.0  ;;  %v724_v10 = vsel %vm480_vm0, %v708_v7, 0.0  ;;  %1577 = vmatpush3.bf16.msra.mxu1 %v1574_v29  ;;  %v1586_v6 = vpack.c.bf16 %v938_v5, %v937_v2 }
 0x20c   : > { %v695_v11 = vmul.f32 0.03125, %v686_v8  ;;  %728 = vadd.xlane.f32.xlu0 %v727_v9  ;;  %725 = vadd.xlane.f32.xlu1 %v724_v10  ;;  %v683_v12 = vpop.xlane.xlu1 %682 }
 0x20d   : > { %v694_v13 = vmul.f32 0.03125, %v683_v12  ;;  %1579 = vmatprep.subr.bf16.mxu1 %v1578_v32 }
 0x20e   : > { %v1868_v14 = vsub.f32 %v662_v40, %v695_v11 }
 0x20f   : > { %v1870_v15 = vsub.f32 %v661_v41, %v694_v13  ;;  %1581 = vmatpush3.bf16.msra.mxu1 %v1578_v32 }
 0x210   : > { %v711_v16 = vmul.f32 %v1868_v14, %v1868_v14  ;;  %1583 = vmatprep.subr.bf16.mxu1 %v1582_v62 }
 0x211   : > { %v710_v17 = vmul.f32 %v1870_v15, %v1870_v15 }
 0x212   : > { %v733_v18 = vsel %vm480_vm0, %v711_v16, 0.0 }
 0x213   : > { %734 = vadd.xlane.f32.xlu0 %v733_v18  ;;  %v730_v19 = vsel %vm480_vm0, %v710_v17, 0.0  ;;  %1585 = vmatpush3.bf16.msra.mxu1 %v1582_v62 }
 0x214   : > { %731 = vadd.xlane.f32.xlu1 %v730_v19  ;;  %1587 = vmatprep.subr.bf16.mxu1 %v1586_v6 }
 0x217   : > { %1589 = vmatpush3.bf16.msra.mxu1 %v1586_v6 }
 0x288   : > { %v717_v33 = vpop.xlane.xlu0 %716 }
 0x289   : > { %v737_v34 = vmul.f32 0.03125, %v717_v33  ;;  %v714_v35 = vpop.xlane.xlu1 %713 }
 0x28a   : > { %v736_v36 = vmul.f32 0.03125, %v714_v35 }
 0x28b   : > { %v745_v37 = vadd.f32 1e-05, %v737_v34 }
 0x28c   : > { %v744_v38 = vadd.f32 1e-05, %v736_v36 }
 0x28d   : > { %1604 = vrsqrt.f32 %v745_v37 }
 0x28e   : > { %1606 = vrsqrt.f32 %v744_v38 }
 0x291   : > { %v720_v39 = vpop.xlane.xlu1 %719 }
 0x292   : > { %v738_v40 = vmul.f32 0.03125, %v720_v39 }
 0x294   : > { %v746_v41 = vadd.f32 1e-05, %v738_v40 }
 0x295   : > { %v723_v42 = vpop.xlane.xlu0 %722 }
 0x296   : > { %1608 = vrsqrt.f32 %v746_v41  ;;  %v739_v43 = vmul.f32 0.03125, %v723_v42 }
 0x297   : > { %v1605_v44 = vpop.eup %1604 }
 0x298   : > { %v1607_v46 = vpop.eup %1606  ;;  %v761_v47 = vmul.f32 %v1605_v44, %v1838_v48  ;;  %v747_v50 = vadd.f32 1e-05, %v739_v43 }
 0x299   : > { %v760_v52 = vmul.f32 %v1607_v46, %v1840_v49  ;;  %v729_v53 = vpop.xlane.xlu0 %728  ;;  %v726_v54 = vpop.xlane.xlu1 %725 }
 0x29a   : > { %v776_v48 = vmul.f32 %v1921_v45, %v761_v47  ;;  %1610 = vrsqrt.f32 %v747_v50  ;;  %v741_v58 = vmul.f32 0.03125, %v729_v53  ;;  %v740_v59 = vmul.f32 0.03125, %v726_v54 }
 0x29b   : > { %v775_v61 = vmul.f32 %v1921_v45, %v760_v52 }
 0x29c   : > { %v791_v49 = vadd.f32 %v1927_v51, %v776_v48  ;;  %v749_v63 = vadd.f32 1e-05, %v741_v58  ;;  %v748_v0 = vadd.f32 1e-05, %v740_v59 }
 0x29d   : > { %v790_v1 = vadd.f32 %v1927_v51, %v775_v61 }
 0x29e   : > { %816 = vst.msk [vmem:[#allocation2 + $0x11] sm:$0xff] %vm480_vm0, %v791_v49  ;;  %1612 = vrsqrt.f32 %v749_v63 }
 0x29f   : > { %815 = vst.msk [vmem:[#allocation2 + $0x1] sm:$0xff] %vm480_vm0, %v790_v1  ;;  %1614 = vrsqrt.f32 %v748_v0 }
 0x2a0   : > { %v1609_v7 = vpop.eup %1608  ;;  %v735_v8 = vpop.xlane.xlu0 %734 }
 0x2a1   : > { %v762_v9 = vmul.f32 %v1609_v7, %v1848_v56  ;;  %v743_v10 = vmul.f32 0.03125, %v735_v8  ;;  %v732_v11 = vpop.xlane.xlu1 %731 }
 0x2a2   : > { %v742_v12 = vmul.f32 0.03125, %v732_v11 }
 0x2a3   : > { %v777_v13 = vmul.f32 %v1921_v45, %v762_v9  ;;  %v751_v16 = vadd.f32 1e-05, %v743_v10 }
 0x2a4   : > { %v1611_v17 = vpop.eup %1610  ;;  %v750_v18 = vadd.f32 1e-05, %v742_v12 }
 0x2a5   : > { %v792_v19 = vadd.f32 %v1927_v51, %v777_v13  ;;  %v763_v20 = vmul.f32 %v1611_v17, %v1852_v60  ;;  %1616 = vrsqrt.f32 %v751_v16  ;;  %v832_v21 = vld [vmem:[#allocation2 + $0x11] sm:$0xff] }
 0x2a6   : > { %v840_v22 = vld [vmem:[#allocation2 + $0x12] sm:$0xff]  ;;  %1618 = vrsqrt.f32 %v750_v18  ;;  %857 = vrot.lane.b32.xlu0 %v832_v21, %s1645_s24  ;;  %v831_v27 = vld [vmem:[#allocation2 + $0x1] sm:$0xff] }
 0x2a7   : > { %889 = vrot.lane.b32.xlu1 %v840_v22, %s1644_s23  ;;  %817 = vst.msk [vmem:[#allocation2 + $0x21] sm:$0xff] %vm480_vm0, %v792_v19  ;;  %v778_v56 = vmul.f32 %v1921_v45, %v763_v20  ;;  %v839_v31 = vld [vmem:[#allocation2 + $0x2] sm:$0xff]  ;;  %v824_v54 = vld [vmem:[#allocation2 + $0x10] sm:$0xff] }
 0x2a8   : > { %v1613_v23 = vpop.eup %1612  ;;  %v823_v57 = vld [vmem:[#allocation2] sm:$0xff] }
 0x2a9   : > { %v1615_v24 = vpop.eup %1614  ;;  %v793_v25 = vadd.f32 %v1927_v51, %v778_v56  ;;  %v765_v26 = vmul.f32 %v1613_v23, %v1857_v3 }
 0x2aa   : > { %v764_v60 = vmul.f32 %v1615_v24, %v1859_v4 }
 0x2ab   : > { %855 = vrot.lane.b32.xlu1 %v831_v27, %s1645_s24  ;;  %818 = vst.msk [vmem:[#allocation2 + $0x31] sm:$0xff] %vm480_vm0, %v793_v25  ;;  %v780_v28 = vmul.f32 %v1921_v45, %v765_v26 }
 0x2ac   : > { %v779_v29 = vmul.f32 %v1921_v45, %v764_v60 }
 0x2ad   : > { %v795_v30 = vadd.f32 %v1927_v51, %v780_v28 }
 0x2ae   : > { %v794_v32 = vadd.f32 %v1927_v51, %v779_v29  ;;  %v833_v33 = vld [vmem:[#allocation2 + $0x21] sm:$0xff]  ;;  %v1422_v29 = vld [vmem:[%s2113_s6] ss:$0 sm:$0xff] }
 0x2af   : > { %887 = vrot.lane.b32.xlu1 %v839_v31, %s1644_s23  ;;  %v1617_v3 = vpop.eup %1616  ;;  %820 = vst.msk [vmem:[#allocation2 + $0x51] sm:$0xff] %vm480_vm0, %v795_v30  ;;  %859 = vrot.lane.b32.xlu0 %v833_v33, %s1645_s24  ;;  %v841_v38 = vld [vmem:[#allocation2 + $0x22] sm:$0xff] }
 0x2b0   : > { %v1619_v4 = vpop.eup %1618  ;;  %819 = vst.msk [vmem:[#allocation2 + $0x41] sm:$0xff] %vm480_vm0, %v794_v32  ;;  %v767_v34 = vmul.f32 %v1617_v3, %v1868_v14  ;;  %v825_v49 = vld [vmem:[#allocation2 + $0x20] sm:$0xff] }
 0x2b1   : > { %v766_v35 = vmul.f32 %v1619_v4, %v1870_v15 }
 0x2b2   : > { %v782_v36 = vmul.f32 %v1921_v45, %v767_v34  ;;  %v834_v37 = vld [vmem:[#allocation2 + $0x31] sm:$0xff] }
 0x2b3   : > { %v781_v39 = vmul.f32 %v1921_v45, %v766_v35  ;;  %861 = vrot.lane.b32.xlu1 %v834_v37, %s1645_s24  ;;  %891 = vrot.lane.b32.xlu0 %v841_v38, %s1644_s23  ;;  %v842_v42 = vld [vmem:[#allocation2 + $0x32] sm:$0xff] }
 0x2b4   : > { %v797_v40 = vadd.f32 %v1927_v51, %v782_v36  ;;  %v826_v5 = vld [vmem:[#allocation2 + $0x30] sm:$0xff] }
 0x2b5   : > { %v796_v41 = vadd.f32 %v1927_v51, %v781_v39 }
 0x2b6   : > { %822 = vst.msk [vmem:[#allocation2 + $0x71] sm:$0xff] %vm480_vm0, %v797_v40  ;;  %v836_v15 = vld [vmem:[#allocation2 + $0x51] sm:$0xff] }
 0x2b7   : > { %821 = vst.msk [vmem:[#allocation2 + $0x61] sm:$0xff] %vm480_vm0, %v796_v41  ;;  %893 = vrot.lane.b32.xlu1 %v842_v42, %s1644_s23  ;;  %v835_v14 = vld [vmem:[#allocation2 + $0x41] sm:$0xff]  ;;  %v844_v44 = vld [vmem:[#allocation2 + $0x52] sm:$0xff] }
 0x2b8   : > { %863 = vrot.lane.b32.xlu0 %v835_v14, %s1645_s24  ;;  %v843_v43 = vld [vmem:[#allocation2 + $0x42] sm:$0xff]  ;;  %v828_v17 = vld [vmem:[#allocation2 + $0x50] sm:$0xff] }
 0x2b9   : > { %v827_v10 = vld [vmem:[#allocation2 + $0x40] sm:$0xff] }
 0x2bb   : > { %865 = vrot.lane.b32.xlu1 %v836_v15, %s1645_s24 }
 0x2bc   : > { %895 = vrot.lane.b32.xlu0 %v843_v43, %s1644_s23 }
 0x2bd   : > { %v838_v46 = vld [vmem:[#allocation2 + $0x71] sm:$0xff] }
 0x2be   : > { %v837_v45 = vld [vmem:[#allocation2 + $0x61] sm:$0xff]  ;;  %v846_v50 = vld [vmem:[#allocation2 + $0x72] sm:$0xff] }
 0x2bf   : > { %897 = vrot.lane.b32.xlu1 %v844_v44, %s1644_s23  ;;  %v845_v47 = vld [vmem:[#allocation2 + $0x62] sm:$0xff]  ;;  %v830_v26 = vld [vmem:[#allocation2 + $0x70] sm:$0xff] }
 0x2c0   : > { %867 = vrot.lane.b32.xlu0 %v837_v45, %s1645_s24  ;;  %v829_v22 = vld [vmem:[#allocation2 + $0x60] sm:$0xff] }
 0x2c3   : > { %869 = vrot.lane.b32.xlu1 %v838_v46, %s1645_s24 }
 0x2c4   : > { %899 = vrot.lane.b32.xlu0 %v845_v47, %s1644_s23 }
 0x2c7   : > { %901 = vrot.lane.b32.xlu1 %v846_v50, %s1644_s23 }
 0x318   : > { %v858_v52 = vpop.permute.xlu0 %857 }
 0x319   : > { %v890_v51 = vpop.permute.xlu1 %889  ;;  %v912_v55 = vsel %vm480_vm0, %v824_v54, %v858_v52 }
 0x31a   : > { %v920_v62 = vsel %vm489_vm1, %v912_v55, %v890_v51 }
 0x31d   : > { %v856_v53 = vpop.permute.xlu1 %855 }
 0x31e   : > { %v911_v48 = vsel %vm480_vm0, %v823_v57, %v856_v53 }
 0x321   : > { %v888_v58 = vpop.permute.xlu1 %887  ;;  %v860_v59 = vpop.permute.xlu0 %859 }
 0x322   : > { %v919_v61 = vsel %vm489_vm1, %v911_v48, %v888_v58  ;;  %v913_v63 = vsel %vm480_vm0, %v825_v49, %v860_v59 }
 0x323   : > { %1530 = vmatprep.mubr.msk.f32.mxu1 %vm510_vm2, %v919_v61 }
 0x324   : > { %1531 = vmatmul.mubr.msk.f32.vlgmr.msra.gmra.mrb[0].mxu1 %vm510_vm2, %v920_v62 }
 0x325   : > { %v892_v0 = vpop.permute.xlu0 %891  ;;  %v862_v1 = vpop.permute.xlu1 %861 }
 0x326   : > { %v921_v2 = vsel %vm489_vm1, %v913_v63, %v892_v0  ;;  %v914_v6 = vsel %vm480_vm0, %v826_v5, %v862_v1 }
 0x327   : > { %1533 = vmatprep.mubr.msk.f32.mxu1 %vm510_vm2, %v921_v2 }
 0x329   : > { %v894_v7 = vpop.permute.xlu1 %893 }
 0x32a   : > { %v864_v8 = vpop.permute.xlu0 %863  ;;  %v922_v9 = vsel %vm489_vm1, %v914_v6, %v894_v7 }
 0x32b   : > { %1534 = vmatmul.mubr.msk.f32.gmra.mrb[2].mxu1 %vm510_vm2, %v922_v9  ;;  %v915_v12 = vsel %vm480_vm0, %v827_v10, %v864_v8 }
 0x32d   : > { %v866_v11 = vpop.permute.xlu1 %865 }
 0x32e   : > { %v896_v13 = vpop.permute.xlu0 %895  ;;  %v916_v18 = vsel %vm480_vm0, %v828_v17, %v866_v11 }
 0x32f   : > { %v923_v16 = vsel %vm489_vm1, %v915_v12, %v896_v13 }
 0x330   : > { %1536 = vmatprep.mubr.msk.f32.mxu1 %vm510_vm2, %v923_v16 }
 0x331   : > { %v898_v19 = vpop.permute.xlu1 %897 }
 0x332   : > { %v868_v20 = vpop.permute.xlu0 %867  ;;  %v924_v21 = vsel %vm489_vm1, %v916_v18, %v898_v19 }
 0x333   : > { %1537 = vmatmul.mubr.msk.f32.gmra.mrb[4].mxu1 %vm510_vm2, %v924_v21  ;;  %v917_v23 = vsel %vm480_vm0, %v829_v22, %v868_v20 }
 0x335   : > { %v870_v56 = vpop.permute.xlu1 %869 }
 0x336   : > { %v900_v24 = vpop.permute.xlu0 %899  ;;  %v918_v27 = vsel %vm480_vm0, %v830_v26, %v870_v56 }
 0x337   : > { %v925_v25 = vsel %vm489_vm1, %v917_v23, %v900_v24 }
 0x338   : > { %1539 = vmatprep.mubr.msk.f32.mxu1 %vm510_vm2, %v925_v25 }
 0x339   : > { %v902_v60 = vpop.permute.xlu1 %901 }
 0x33a   : > { %v926_v28 = vsel %vm489_vm1, %v918_v27, %v902_v60 }
 0x33b   : > { %1540 = vmatmul.mubr.msk.f32.gmra.mrb[6].mxu1 %vm510_vm2, %v926_v28 }
 0x3f7   : > { %v1532_v30 = vpop.f32.mrb[0].mxu1 }
 0x3f8   : > { %v1076_v31 = vadd.f32 %v1532_v30, %v1422_v29  ;;  %v1029_v32 = vpop.f32.mrb[1].mxu1 }
 0x3f9   : > { %v1075_v33 = vadd.f32 %v1422_v29, %v1029_v32 }
 0x3fa   : > { %v1084_v3 = vmax.f32 %v1076_v31, 0.0 }
 0x3fb   : > { %v1083_v4 = vmax.f32 %v1075_v33, 0.0 }
 0x3fc   : > { %v1094_v34 = vsel %vm480_vm0, %v1084_v3, 0.0 }
 0x3fd   : > { %1095 = vadd.xlane.f32.xlu1 %v1094_v34  ;;  %v1091_v35 = vsel %vm480_vm0, %v1083_v4, 0.0 }
 0x3fe   : > { %1092 = vadd.xlane.f32.xlu0 %v1091_v35  ;;  %v1535_v36 = vpop.f32.mrb[2].mxu1 }
 0x3ff   : > { %v1078_v37 = vadd.f32 %v1535_v36, %v1422_v29  ;;  %v1039_v38 = vpop.f32.mrb[3].mxu1  ;;  %v1647_v36 = vmov 0  }
 0x400   : > { %v1077_v39 = vadd.f32 %v1422_v29, %v1039_v38  ;;  %1602 = vset.pattern.permute.xlu1 %v1647_v36  ;;  %1603 = vset.pattern.permute.xlu0 %v1647_v36 }
 0x401   : > { %v1086_v40 = vmax.f32 %v1078_v37, 0.0 }
 0x402   : > { %v1085_v41 = vmax.f32 %v1077_v39, 0.0 }
 0x403   : > { %v1100_v42 = vsel %vm480_vm0, %v1086_v40, 0.0 }
 0x404   : > { %1101 = vadd.xlane.f32.xlu0 %v1100_v42  ;;  %v1097_v44 = vsel %vm480_vm0, %v1085_v41, 0.0 }
 0x406   : > { %v1538_v14 = vpop.f32.mrb[4].mxu1 }
 0x407   : > { %v1080_v15 = vadd.f32 %v1538_v14, %v1422_v29  ;;  %v1049_v43 = vpop.f32.mrb[5].mxu1 }
 0x408   : > { %v1079_v45 = vadd.f32 %v1422_v29, %v1049_v43  ;;  %1098 = vadd.xlane.f32.xlu0 %v1097_v44 }
 0x409   : > { %v1088_v46 = vmax.f32 %v1080_v15, 0.0 }
 0x40a   : > { %v1087_v47 = vmax.f32 %v1079_v45, 0.0 }
 0x40b   : > { %v1106_v50 = vsel %vm480_vm0, %v1088_v46, 0.0 }
 0x40c   : > { %1107 = vadd.xlane.f32.xlu0 %v1106_v50  ;;  %v1103_v51 = vsel %vm480_vm0, %v1087_v47, 0.0  ;;  %v2066_v50 = vld [vmem:[%s2114_s7] ss:$0 sm:$0xff] }
 0x40d   : > { %1104 = vadd.xlane.f32.xlu1 %v1103_v51 }
 0x40e   : > { %v1541_v52 = vpop.f32.mrb[6].mxu1 }
 0x40f   : > { %v1082_v53 = vadd.f32 %v1541_v52, %v1422_v29  ;;  %v1059_v54 = vpop.f32.mrb[7].mxu1 }
 0x410   : > { %v1081_v55 = vadd.f32 %v1422_v29, %v1059_v54 }
 0x411   : > { %v1090_v57 = vmax.f32 %v1082_v53, 0.0 }
 0x412   : > { %v1089_v48 = vmax.f32 %v1081_v55, 0.0 }
 0x413   : > { %v1112_v58 = vsel %vm480_vm0, %v1090_v57, 0.0 }
 0x414   : > { %1113 = vadd.xlane.f32.xlu0 %v1112_v58  ;;  %v1109_v59 = vsel %vm480_vm0, %v1089_v48, 0.0 }
 0x415   : > { %1110 = vadd.xlane.f32.xlu1 %v1109_v59 }
 0x48a   : > { %v1096_v61 = vpop.xlane.xlu1 %1095 }
 0x48b   : > { %v1116_v62 = vmul.f32 0.03125, %v1096_v61  ;;  %v1093_v49 = vpop.xlane.xlu0 %1092 }
 0x48c   : > { %v1115_v63 = vmul.f32 0.03125, %v1093_v49 }
 0x48d   : > { %v2023_v0 = vsub.f32 %v1084_v3, %v1116_v62  ;;  %v1425_v62 = vld [vmem:[%s2116_s9] ss:$0 sm:$0xff] }
 0x48e   : > { %v2025_v1 = vsub.f32 %v1083_v4, %v1115_v63 }
 0x48f   : > { %v1132_v2 = vmul.f32 %v2023_v0, %v2023_v0 }
 0x490   : > { %v1131_v5 = vmul.f32 %v2025_v1, %v2025_v1 }
 0x491   : > { %v1142_v6 = vsel %vm480_vm0, %v1132_v2, 0.0  ;;  %v1102_v7 = vpop.xlane.xlu0 %1101 }
 0x492   : > { %1143 = vadd.xlane.f32.xlu0 %v1142_v6  ;;  %v1139_v8 = vsel %vm480_vm0, %v1131_v5, 0.0  ;;  %v1118_v9 = vmul.f32 0.03125, %v1102_v7 }
 0x493   : > { %1140 = vadd.xlane.f32.xlu1 %v1139_v8 }
 0x494   : > { %v2033_v10 = vsub.f32 %v1086_v40, %v1118_v9 }
 0x495   : > { %v1099_v11 = vpop.xlane.xlu0 %1098 }
 0x496   : > { %v1117_v12 = vmul.f32 0.03125, %v1099_v11  ;;  %v1134_v13 = vmul.f32 %v2033_v10, %v2033_v10 }
 0x498   : > { %v2037_v16 = vsub.f32 %v1085_v41, %v1117_v12  ;;  %v1148_v17 = vsel %vm480_vm0, %v1134_v13, 0.0 }
 0x499   : > { %v1108_v18 = vpop.xlane.xlu0 %1107  ;;  %1149 = vadd.xlane.f32.xlu0 %v1148_v17 }
 0x49a   : > { %v1120_v19 = vmul.f32 0.03125, %v1108_v18  ;;  %v1105_v20 = vpop.xlane.xlu1 %1104  ;;  %v1133_v21 = vmul.f32 %v2037_v16, %v2037_v16 }
 0x49b   : > { %v1119_v22 = vmul.f32 0.03125, %v1105_v20 }
 0x49c   : > { %v2042_v56 = vsub.f32 %v1088_v46, %v1120_v19  ;;  %v1145_v23 = vsel %vm480_vm0, %v1133_v21, 0.0 }
 0x49d   : > { %v2045_v24 = vsub.f32 %v1087_v47, %v1119_v22  ;;  %1146 = vadd.xlane.f32.xlu1 %v1145_v23 }
 0x49e   : > { %v1136_v25 = vmul.f32 %v2042_v56, %v2042_v56 }
 0x49f   : > { %v1135_v26 = vmul.f32 %v2045_v24, %v2045_v24 }
 0x4a0   : > { %v1154_v27 = vsel %vm480_vm0, %v1136_v25, 0.0 }
 0x4a1   : > { %v1114_v60 = vpop.xlane.xlu0 %1113  ;;  %1155 = vadd.xlane.f32.xlu0 %v1154_v27  ;;  %v1151_v28 = vsel %vm480_vm0, %v1135_v26, 0.0 }
 0x4a2   : > { %v1122_v29 = vmul.f32 0.03125, %v1114_v60  ;;  %1152 = vadd.xlane.f32.xlu1 %v1151_v28  ;;  %v1111_v30 = vpop.xlane.xlu1 %1110 }
 0x4a3   : > { %v1121_v31 = vmul.f32 0.03125, %v1111_v30 }
 0x4a4   : > { %v2053_v32 = vsub.f32 %v1090_v57, %v1122_v29  ;;  %v1424_v57 = vld [vmem:[%s2115_s8] ss:$0 sm:$0xff] }
 0x4a5   : > { %v2055_v33 = vsub.f32 %v1089_v48, %v1121_v31 }
 0x4a6   : > { %v1138_v3 = vmul.f32 %v2053_v32, %v2053_v32 }
 0x4a7   : > { %v1137_v4 = vmul.f32 %v2055_v33, %v2055_v33 }
 0x4a8   : > { %v1160_v34 = vsel %vm480_vm0, %v1138_v3, 0.0 }
 0x4a9   : > { %1161 = vadd.xlane.f32.xlu0 %v1160_v34  ;;  %v1157_v35 = vsel %vm480_vm0, %v1137_v4, 0.0 }
 0x4aa   : > { %1158 = vadd.xlane.f32.xlu1 %v1157_v35 }
 0x51f   : > { %v1144_v37 = vpop.xlane.xlu0 %1143 }
 0x520   : > { %v1164_v38 = vmul.f32 0.03125, %v1144_v37  ;;  %v1141_v39 = vpop.xlane.xlu1 %1140 }
 0x521   : > { %v1163_v40 = vmul.f32 0.03125, %v1141_v39 }
 0x522   : > { %v1172_v41 = vadd.f32 1e-05, %v1164_v38 }
 0x523   : > { %v1171_v42 = vadd.f32 1e-05, %v1163_v40 }
 0x524   : > { %1620 = vrsqrt.f32 %v1172_v41 }
 0x525   : > { %1622 = vrsqrt.f32 %v1171_v42 }
 0x526   : > { %v1150_v14 = vpop.xlane.xlu0 %1149 }
 0x527   : > { %v1166_v15 = vmul.f32 0.03125, %v1150_v14 }
 0x529   : > { %v1174_v43 = vadd.f32 1e-05, %v1166_v15 }
 0x52a   : > { %v1147_v44 = vpop.xlane.xlu1 %1146 }
 0x52b   : > { %1624 = vrsqrt.f32 %v1174_v43  ;;  %v1165_v45 = vmul.f32 0.03125, %v1147_v44 }
 0x52d   : > { %v1173_v47 = vadd.f32 1e-05, %v1165_v45 }
 0x52e   : > { %v1621_v46 = vpop.eup %1620  ;;  %v1156_v52 = vpop.xlane.xlu0 %1155 }
 0x52f   : > { %v1623_v51 = vpop.eup %1622  ;;  %v1188_v53 = vmul.f32 %v1621_v46, %v2023_v0  ;;  %1626 = vrsqrt.f32 %v1173_v47  ;;  %v1168_v54 = vmul.f32 0.03125, %v1156_v52  ;;  %v1153_v55 = vpop.xlane.xlu1 %1152  ;;  %v1426_v47 = vld [vmem:[#allocation3] ss:$0 sm:$0xff]  ;;  %v1290_v52 = vlaneseq }
 0x530   : > { %v1187_v48 = vmul.f32 %v1623_v51, %v2025_v1  ;;  %v1167_v58 = vmul.f32 0.03125, %v1153_v55 }
 0x531   : > { %v1203_v59 = vmul.f32 %v2066_v50, %v1188_v53  ;;  %v1176_v61 = vadd.f32 1e-05, %v1168_v54  ;;  %v1293_v55 = vshrl.u32 %v1290_v52, 7 }
 0x532   : > { %v1202_v49 = vmul.f32 %v2066_v50, %v1187_v48  ;;  %v1175_v63 = vadd.f32 1e-05, %v1167_v58 }
 0x533   : > { %v1218_v0 = vadd.f32 %v1424_v57, %v1203_v59  ;;  %1628 = vrsqrt.f32 %v1176_v61 }
 0x534   : > { %v1217_v2 = vadd.f32 %v1424_v57, %v1202_v49  ;;  %1630 = vrsqrt.f32 %v1175_v63 }
 0x535   : > { %v1233_v5 = vmul.f32 %v1425_v62, %v1218_v0  ;;  %v1625_v6 = vpop.eup %1624 }
 0x536   : > { %v1232_v7 = vmul.f32 %v1425_v62, %v1217_v2  ;;  %v1162_v8 = vpop.xlane.xlu0 %1161  ;;  %v1190_v9 = vmul.f32 %v1625_v6, %v2033_v10 }
 0x537   : > { %v1243_v1 = vsel %vm480_vm0, %v1233_v5, 0.0  ;;  %v1170_v11 = vmul.f32 0.03125, %v1162_v8  ;;  %v1159_v12 = vpop.xlane.xlu1 %1158 }
 0x538   : > { %1244 = vadd.xlane.f32.xlu0 %v1243_v1  ;;  %v1240_v13 = vsel %vm480_vm0, %v1232_v7, 0.0  ;;  %v1169_v17 = vmul.f32 0.03125, %v1159_v12  ;;  %v1205_v18 = vmul.f32 %v2066_v50, %v1190_v9 }
 0x539   : > { %1241 = vadd.xlane.f32.xlu1 %v1240_v13  ;;  %v1627_v19 = vpop.eup %1626  ;;  %v1178_v20 = vadd.f32 1e-05, %v1170_v11 }
 0x53a   : > { %v1177_v21 = vadd.f32 1e-05, %v1169_v17  ;;  %v1220_v22 = vadd.f32 %v1424_v57, %v1205_v18  ;;  %v1189_v23 = vmul.f32 %v1627_v19, %v2037_v16 }
 0x53b   : > { %1632 = vrsqrt.f32 %v1178_v20 }
 0x53c   : > { %1634 = vrsqrt.f32 %v1177_v21  ;;  %v1235_v25 = vmul.f32 %v1425_v62, %v1220_v22  ;;  %v1204_v10 = vmul.f32 %v2066_v50, %v1189_v23 }
 0x53d   : > { %v1629_v26 = vpop.eup %1628 }
 0x53e   : > { %v1631_v27 = vpop.eup %1630  ;;  %v1249_v60 = vsel %vm480_vm0, %v1235_v25, 0.0  ;;  %v1219_v28 = vadd.f32 %v1424_v57, %v1204_v10  ;;  %v1192_v29 = vmul.f32 %v1629_v26, %v2042_v56 }
 0x53f   : > { %1250 = vadd.xlane.f32.xlu0 %v1249_v60  ;;  %v1191_v30 = vmul.f32 %v1631_v27, %v2045_v24 }
 0x540   : > { %v1234_v31 = vmul.f32 %v1425_v62, %v1219_v28  ;;  %v1207_v3 = vmul.f32 %v2066_v50, %v1192_v29 }
 0x541   : > { %v1206_v16 = vmul.f32 %v2066_v50, %v1191_v30 }
 0x542   : > { %v1246_v4 = vsel %vm480_vm0, %v1234_v31, 0.0  ;;  %v1222_v34 = vadd.f32 %v1424_v57, %v1207_v3 }
 0x543   : > { %1247 = vadd.xlane.f32.xlu1 %v1246_v4  ;;  %v1221_v35 = vadd.f32 %v1424_v57, %v1206_v16 }
 0x544   : > { %v1237_v36 = vmul.f32 %v1425_v62, %v1222_v34 }
 0x545   : > { %v1633_v37 = vpop.eup %1632  ;;  %v1236_v38 = vmul.f32 %v1425_v62, %v1221_v35 }
 0x546   : > { %v1635_v39 = vpop.eup %1634  ;;  %v1255_v40 = vsel %vm480_vm0, %v1237_v36, 0.0  ;;  %v1194_v56 = vmul.f32 %v1633_v37, %v2053_v32 }
 0x547   : > { %1256 = vadd.xlane.f32.xlu0 %v1255_v40  ;;  %v1252_v24 = vsel %vm480_vm0, %v1236_v38, 0.0  ;;  %v1193_v41 = vmul.f32 %v1635_v39, %v2055_v33 }
 0x548   : > { %1253 = vadd.xlane.f32.xlu1 %v1252_v24  ;;  %v1209_v42 = vmul.f32 %v2066_v50, %v1194_v56 }
 0x549   : > { %v1208_v14 = vmul.f32 %v2066_v50, %v1193_v41  ;;  %v1291_v50 = vand.u32 127, %v1290_v52 }
 0x54a   : > { %v1224_v15 = vadd.f32 %v1424_v57, %v1209_v42 }
 0x54b   : > { %v1223_v43 = vadd.f32 %v1424_v57, %v1208_v14  ;;  %v1294_v58 = vsub.s32 %v1291_v50, %v1293_v55 }
 0x54c   : > { %v1239_v44 = vmul.f32 %v1425_v62, %v1224_v15 }
 0x54d   : > { %v1238_v45 = vmul.f32 %v1425_v62, %v1223_v43 }
 0x54e   : > { %v1261_v46 = vsel %vm480_vm0, %v1239_v44, 0.0 }
 0x54f   : > { %1262 = vadd.xlane.f32.xlu0 %v1261_v46  ;;  %v1258_v32 = vsel %vm480_vm0, %v1238_v45, 0.0 }
 0x550   : > { %1259 = vadd.xlane.f32.xlu1 %v1258_v32 }
 0x561   : > { %1271 = vperm.xlu1 %1602, %v1426_v47  }
 0x5c5   : > { %v1245_v53 = vpop.xlane.xlu0 %1244 }
 0x5c6   : > { %v1242_v51 = vpop.xlane.xlu1 %1241 }
 0x5cc   : > { %v1251_v57 = vpop.xlane.xlu0 %1250 }
 0x5d0   : > { %v1248_v33 = vpop.xlane.xlu1 %1247 }
 0x5d4   : > { %v1257_v59 = vpop.xlane.xlu0 %1256 }
 0x5d5   : > { %v1254_v54 = vpop.xlane.xlu1 %1253 }
 0x5dc   : > { %v1263_v1 = vpop.xlane.xlu0 %1262 }
 0x5dd   : > { %v1260_v48 = vpop.xlane.xlu1 %1259 }
 0x5e1   : > { %v1272_v61 = vpop.permute.xlu1 %1271 }
 0x5e2   : > { %v1274_v62 = vadd.f32 %v1272_v61, %v1242_v51  ;;  %v1275_v49 = vadd.f32 %v1272_v61, %v1245_v53  ;;  %v1276_v63 = vadd.f32 %v1272_v61, %v1248_v33  ;;  %v1277_v0 = vadd.f32 %v1272_v61, %v1251_v57 }
 0x5e3   : > { %v1278_v2 = vadd.f32 %v1272_v61, %v1254_v54  ;;  %v1279_v5 = vadd.f32 %v1272_v61, %v1257_v59  ;;  %v1280_v9 = vadd.f32 %v1272_v61, %v1260_v48  ;;  %v1281_v11 = vadd.f32 %v1272_v61, %v1263_v1 }
 0x5e4   : > { %v1295_v6 = vrot.slane %v1274_v62, %v1294_v58  ;;  %v1299_v7 = vrot.slane %v1275_v49, %v1294_v58  ;;  %v1303_v8 = vrot.slane %v1276_v63, %v1294_v58  ;;  %v1307_v12 = vrot.slane %v1277_v0, %v1294_v58 }
 0x5e5   : > { %v1311_v17 = vrot.slane %v1278_v2, %v1294_v58  ;;  %v1315_v19 = vrot.slane %v1279_v5, %v1294_v58  ;;  %v1319_v21 = vrot.slane %v1280_v9, %v1294_v58  ;;  %v1323_v23 = vrot.slane %v1281_v11, %v1294_v58 }
 0x5e6   : > { %v1325_v13 = vsel %vm1324_vm4, %v1299_v7, %v1295_v6 }
 0x5e7   : > { %v1327_v18 = vsel %vm1326_vm5, %v1303_v8, %v1325_v13 }
 0x5e8   : > { %v1329_v20 = vsel %vm1328_vm6, %v1307_v12, %v1327_v18 }
 0x5e9   : > { %v1331_v22 = vsel %vm1330_vm7, %v1311_v17, %v1329_v20 }
 0x5ea   : > { %v1333_v25 = vsel %vm1332_vm8, %v1315_v19, %v1331_v22 }
 0x5eb   : > { %v1335_v10 = vsel %vm1334_vm9, %v1319_v21, %v1333_v25 }
 0x5ec   : > { %v1337_v26 = vsel %vm1336_vm10, %v1323_v23, %v1335_v10 }
 0x5ed   : > { %1340 = vst.msk [vmem:[%s391_s21] sm:$0xff] %vm1339_vm11, %v1337_v26 }
 0x5ee PF: > { %s23_s19 = sadd.s32 1, %s1642_s19  }
 0x5ef   : > { %p20_p5 = scmp.ge.s32.totalorder %s23_s19, 4  }
 0x5f1   :  { %22 = sbr.rel (!%p20_p5) target bundleno = 3 (0x3), region = 94 }

</bundles_post_ra>
